<compile_context>
chip_gen: v6e
topology: v6e:2x2x1
jax: 0.10.0
libtpu: 0.0.40
codegen_flags: <defaults>
</compile_context>

<pallas_src>
import functools

import jax
import jax.numpy as jnp
from jax.experimental import pallas as pl
from jax.experimental.pallas import tpu as pltpu


_LANE = 128
_BUF_BUDGET_BYTES = 32 * 1024 * 1024   # budget for 2 in + 2 out pipeline buffers
_VMEM_LIMIT_BYTES = 48 * 1024 * 1024   # explicit scoped-VMEM limit (fits v7x 64 MiB)


def _se_kernel(x_ref, w1_ref, w2_ref, o_ref, *, inv_hw):
    # x_ref : (TB, C, HWp)   w1_ref : (C, Cr)   w2_ref : (Cr, C)
    x = x_ref[...].astype(jnp.float32)                      # (TB, C, HWp)

    # squeeze: global average pool over the (unpadded) spatial axis.
    # Zero padding contributes nothing to the sum, so dividing by the real
    # HW gives the exact mean.
    y = jnp.sum(x, axis=2) * inv_hw                         # (TB, C)

    # excitation: Linear(C -> C//r, no bias) -> ReLU -> Linear(C//r -> C, no bias)
    # (no sigmoid, matching the PyTorch module exactly). Batched over TB rows.
    h = jnp.maximum(
        jnp.dot(y, w1_ref[...].astype(jnp.float32),
                preferred_element_type=jnp.float32), 0.0)    # (TB, Cr)
    s = jnp.dot(h, w2_ref[...].astype(jnp.float32),
                preferred_element_type=jnp.float32)          # (TB, C)

    # scale: x * s broadcast over the spatial axis
    o_ref[...] = (x * s[:, :, None]).astype(o_ref.dtype)


def _choose_batch_tile(B, bytes_per_image):
    """Pick TB: big blocks, but keep 2in+2out buffers in budget and grid >= 2."""
    max_tb = max(1, _BUF_BUDGET_BYTES // (4 * bytes_per_image))
    tb = min(B, max_tb)
    if tb >= B and B > 1:
        tb = B // 2          # keep >= 2 parallel grid blocks for v7x's 2 TCs
    tb = max(1, tb)
    while B % tb != 0:       # TB must divide B
        tb -= 1
    return tb


def se_layer(x, w1, w2):
    """x: (B, C, H, W); w1: (C, C//r); w2: (C//r, C). Returns (B, C, H, W)."""
    B, C, H, W = x.shape
    HW = H * W
    HWp = ((HW + _LANE - 1) // _LANE) * _LANE    # lane-dense spatial axis

    x_flat = x.reshape(B, C, HW)
    if HWp != HW:
        x_flat = jnp.pad(x_flat, ((0, 0), (0, 0), (0, HWp - HW)))

    itemsize = jnp.dtype(x.dtype).itemsize
    tb = _choose_batch_tile(B, C * HWp * itemsize)
    grid = (B // tb,)
    # TODO(synk): if a (tb, C, HWp) tile cannot fit in VMEM even at tb=1
    # (very large HW), switch to a two-pass HW-tiled structure: an
    # "arbitrary" HW grid axis accumulating (tb, C) partial sums into a VMEM
    # scratch, followed by a scale pass over the same HW tiles.

    kernel = functools.partial(_se_kernel, inv_hw=1.0 / float(HW))

    out = pl.pallas_call(
        kernel,
        out_shape=jax.ShapeDtypeStruct((B, C, HWp), x.dtype),
        grid_spec=pltpu.PrefetchScalarGridSpec(
            num_scalar_prefetch=0,
            grid=grid,
            in_specs=[
                pl.BlockSpec((tb, C, HWp), lambda b: (b, 0, 0)),
                # tiny, grid-invariant weights: whole array resident in VMEM,
                # no pipelining / double-buffering.
                pl.BlockSpec(memory_space=pltpu.MemorySpace.VMEM),
                pl.BlockSpec(memory_space=pltpu.MemorySpace.VMEM),
            ],
            out_specs=pl.BlockSpec((tb, C, HWp), lambda b: (b, 0, 0)),
        ),
        compiler_params=pltpu.CompilerParams(
            dimension_semantics=("parallel",),
            vmem_limit_bytes=_VMEM_LIMIT_BYTES),
    )(x_flat, w1, w2)

    if HWp != HW:
        out = out[:, :, :HW]
    return out.reshape(B, C, H, W)


def se_layer_ref(x, w1, w2):
    """Pure-JAX reference mirroring the PyTorch forward."""
    xf = x.astype(jnp.float32)
    y = jnp.mean(xf, axis=(2, 3))                      # (B, C)
    h = jnp.maximum(y @ w1.astype(jnp.float32), 0.0)   # (B, C//r)
    s = h @ w2.astype(jnp.float32)                     # (B, C)
    return (xf * s[:, :, None, None]).astype(x.dtype)


if __name__ == "__main__":
    key = jax.random.PRNGKey(0)

    # Test 1: default SELayer config (channel=32, reduction=16), HW already
    # lane-aligned (16*16 = 256), batch tiled into 2 parallel grid blocks.
    B, C, H, W = 2, 32, 16, 16
    Cr = C // 16
    kx, k1, k2, kx2, k3, k4 = jax.random.split(key, 6)
    x = jax.random.normal(kx, (B, C, H, W), dtype=jnp.float32)
    # nn.Linear weights are (out, in) in PyTorch; stored transposed (in, out)
    # so the kernel does y @ W directly.
    w1 = jax.random.normal(k1, (C, Cr), dtype=jnp.float32) * (1.0 / jnp.sqrt(C))
    w2 = jax.random.normal(k2, (Cr, C), dtype=jnp.float32) * (1.0 / jnp.sqrt(Cr))

    out = jax.block_until_ready(se_layer(x, w1, w2))
    ref = se_layer_ref(x, w1, w2)
    assert out.shape == (B, C, H, W)
    assert jnp.allclose(out, ref, atol=1e-5, rtol=1e-5), "mismatch vs reference (test 1)"

    # Test 2: non-128-multiple spatial size (exercises padding path) and a
    # batch tile TB > 1 (B=4 -> grid of 2 blocks of 2 images each).
    B2, C2, H2, W2 = 4, 16, 10, 10
    Cr2 = C2 // 4
    x2 = jax.random.normal(kx2, (B2, C2, H2, W2), dtype=jnp.float32)
    w1b = jax.random.normal(k3, (C2, Cr2), dtype=jnp.float32) * (1.0 / jnp.sqrt(C2))
    w2b = jax.random.normal(k4, (Cr2, C2), dtype=jnp.float32) * (1.0 / jnp.sqrt(Cr2))

    out2 = jax.block_until_ready(se_layer(x2, w1b, w2b))
    ref2 = se_layer_ref(x2, w1b, w2b)
    assert out2.shape == (B2, C2, H2, W2)
    assert jnp.allclose(out2, ref2, atol=1e-5, rtol=1e-5), "mismatch vs reference (test 2)"

    print("KERNEL_OK")
</pallas_src>

<mosaic_0001>
module attributes {stable_mosaic.version = 11 : i64} {
  func.func @_se_kernel(%arg0: i32, %arg1: memref<1x32x256xf32, #tpu.memory_space<vmem>>, %arg2: memref<32x2xf32, #tpu.memory_space<vmem>>, %arg3: memref<2x32xf32, #tpu.memory_space<vmem>>, %arg4: memref<1x32x256xf32, #tpu.memory_space<vmem>>) attributes {dimension_semantics = [#tpu.dimension_semantics<parallel>], iteration_bounds = array<i64: 2>, scalar_prefetch = 0 : i64, scratch_operands = 0 : i64, tpu.core_type = #tpu.core_type<tc>, window_params = [{transform_indices = @transform_0, window_bounds = array<i64: 1, 32, 256>}, {pipeline_mode = #tpu.pipeline_mode<synchronous>, transform_indices = @transform_1, window_bounds = array<i64: 32, 2>}, {pipeline_mode = #tpu.pipeline_mode<synchronous>, transform_indices = @transform_2, window_bounds = array<i64: 2, 32>}, {transform_indices = @transform_3, window_bounds = array<i64: 1, 32, 256>}]} {
    %c0 = arith.constant 0 : index
    %c0_0 = arith.constant 0 : index
    %c0_1 = arith.constant 0 : index
    %0 = vector.load %arg1[%c0, %c0_0, %c0_1] : memref<1x32x256xf32, #tpu.memory_space<vmem>>, vector<1x32x256xf32>
    %cst = arith.constant dense<0.000000e+00> : vector<1x32xf32>
    %1 = vector.multi_reduction <add>, %0, %cst [2] : vector<1x32x256xf32> to vector<1x32xf32>
    %cst_2 = arith.constant 3.906250e-03 : f32
    %2 = vector.broadcast %cst_2 : f32 to vector<1x32xf32>
    %3 = arith.mulf %1, %2 : vector<1x32xf32>
    %c0_3 = arith.constant 0 : index
    %c0_4 = arith.constant 0 : index
    %4 = vector.load %arg2[%c0_3, %c0_4] : memref<32x2xf32, #tpu.memory_space<vmem>>, vector<32x2xf32>
    %cst_5 = arith.constant dense<0.000000e+00> : vector<1x2xf32>
    %5 = tpu.matmul %3, %4, %cst_5 {dimension_numbers = #tpu.dot_dimension_numbers<[1], [0], [0], [1], [0, 0, 1, 1], [], []>} : vector<1x32xf32>, vector<32x2xf32>, vector<1x2xf32> -> vector<1x2xf32>
    %cst_6 = arith.constant 0.000000e+00 : f32
    %6 = vector.broadcast %cst_6 : f32 to vector<1x2xf32>
    %7 = arith.maximumf %5, %6 : vector<1x2xf32>
    %c0_7 = arith.constant 0 : index
    %c0_8 = arith.constant 0 : index
    %8 = vector.load %arg3[%c0_7, %c0_8] : memref<2x32xf32, #tpu.memory_space<vmem>>, vector<2x32xf32>
    %cst_9 = arith.constant dense<0.000000e+00> : vector<1x32xf32>
    %9 = tpu.matmul %7, %8, %cst_9 {dimension_numbers = #tpu.dot_dimension_numbers<[1], [0], [0], [1], [0, 0, 1, 1], [], []>} : vector<1x2xf32>, vector<2x32xf32>, vector<1x32xf32> -> vector<1x32xf32>
    %10 = vector.shape_cast %9 : vector<1x32xf32> to vector<1x32x1xf32>
    %11 = vector.broadcast %10 : vector<1x32x1xf32> to vector<1x32x256xf32>
    %12 = arith.mulf %0, %11 : vector<1x32x256xf32>
    %c0_10 = arith.constant 0 : index
    %c0_11 = arith.constant 0 : index
    %c0_12 = arith.constant 0 : index
    %13 = vector.load %arg4[%c0_10, %c0_11, %c0_12] : memref<1x32x256xf32, #tpu.memory_space<vmem>>, vector<1x32x256xf32>
    tpu.vector_store %arg4[%c0_10, %c0_11, %c0_12], %12 {strides = array<i32>} : memref<1x32x256xf32, #tpu.memory_space<vmem>>, vector<1x32x256xf32>,
    return
  }
  func.func @transform_0(%arg0: i32) -> (i32, i32, i32) {
    %c0_i32 = arith.constant 0 : i32
    %c0_i32_0 = arith.constant 0 : i32
    %c0_i32_1 = arith.constant 0 : i32
    return %arg0, %c0_i32, %c0_i32_0 : i32, i32, i32
  }
  func.func @transform_1(%arg0: i32) -> (i32, i32) {
    %c0_i32 = arith.constant 0 : i32
    %c0_i32_0 = arith.constant 0 : i32
    %c0_i32_1 = arith.constant 0 : i32
    return %c0_i32, %c0_i32_0 : i32, i32
  }
  func.func @transform_2(%arg0: i32) -> (i32, i32) {
    %c0_i32 = arith.constant 0 : i32
    %c0_i32_0 = arith.constant 0 : i32
    %c0_i32_1 = arith.constant 0 : i32
    return %c0_i32, %c0_i32_0 : i32, i32
  }
  func.func @transform_3(%arg0: i32) -> (i32, i32, i32) {
    %c0_i32 = arith.constant 0 : i32
    %c0_i32_0 = arith.constant 0 : i32
    %c0_i32_1 = arith.constant 0 : i32
    return %arg0, %c0_i32, %c0_i32_0 : i32, i32, i32
  }
}

</mosaic_0001>

<bundles_post_ra>
// kernel: tpu_custom_call.1
= control target key start
LH: loop header
LB: loop body
LE: loop exit
PB: predicated region body
PF: predicated region fallthrough
CT: control target
= control target key end

     0   :  { %8 = vsyncpa [#allocation3], 0  ;;  %s944_s0 = inlined_call_operand.hbm [shape: f32[2,32,256], index: 0, kind: input, shape index: {}]   ;;  %s945_s1 = inlined_call_operand.vmem [shape: f32[32,2], index: 1, kind: input, shape index: {}]   ;;  %s946_s2 = inlined_call_operand.vmem [shape: f32[2,32], index: 2, kind: input, shape index: {}]   ;;  %s947_s3 = inlined_call_operand.hbm [shape: f32[2,32,256], index: 3, kind: output, shape index: {}]  }
   0x1   :  { %10 = vsyncpa [#allocation3 + $0x1], 0 }
   0x2   :  { %11 = vsyncpa [#allocation4], 0 }
   0x3   :  { %13 = vsyncpa [#allocation4 + $0x1], 0  ;;  %s739_s12 = smov 0   ;;  %s741_s13 = smov 0  }
   0x4   :  { %s743_s14 = smov 0   ;;  %s745_s15 = smov 0  }
   0x5 LB: > { %s760_s16 = sadd.s32 4294967295, %s709_s15   ;;  %s523_s17 = sadd.s32 4294967294, %s709_s15   ;;  %s709_s15 = sphi %s745_s15, %s962_s15   ;;  %s705_s14 = sphi %s743_s14, %s961_s14   ;;  %s701_s13 = sphi %s741_s13, %s960_s13   ;;  %s697_s12 = sphi %s739_s12, %s959_s12  }
   0x6   : > { %s764_s18 = sadd.s32 1, %s709_s15   ;;  %s26_s19 = sadd.s32 1, %s705_s14 }
   0x7   : > { %s23_s20 = ssub.s32 %s709_s15, %s764_s18  ;;  %p33_p0 = scmp.ne.s32.totalorder %s705_s14, %s701_s13 }
   0x8   : > { %p24_p1 = scmp.eq.s32.totalorder %s23_s20, 0  ;;  %p34_p2 = scmp.eq.s32.totalorder %s709_s15, 0 }
   0x9   : > { %p39_p3 = scmp.ne.s32.totalorder %s701_s13, %s697_s12  ;;  %p40_p4 = scmp.eq.s32.totalorder %s760_s16, 0 }
   0xa   : > { %s776_s21 = scalar_select %p24_p1, %s705_s14, %s26_s19  }
   0xb   : > { %p778_p5 = por %p34_p2, %p33_p0  ;;  %p782_p6 = por %p40_p4, %p39_p3 }
   0xc   : > { %p105_p7 = scmp.eq.s32.totalorder %s760_s16, 1  ;;  %p111_p8 = scmp.eq.s32.totalorder %s523_s17, 1 }
   0xd   : > { %s951_s23 = scalar_select %p782_p6, 1, 0 }
   0xe   : > { %p577_p10 = scmp.lt.s32.totalorder %s709_s15, 2  ;;  %p789_p11 = por %p105_p7, %p33_p0 }
   0xf   : > { %p793_p12 = por %p111_p8, %p39_p3  ;;  %s137_s26 = sand.u32 1, %s705_s14  }
  0x10   : > { %s952_s24 = scalar_select %p789_p11, 1, 0 }
  0x11   : > { %s953_s25 = scalar_select %p793_p12, 1, 0 }
  0x12   : > { %s540_s27 = sshll.u32 %s709_s15, 10  ;;  %s526_s28 = sshll.u32 %s137_s26, 6 }
  0x13   : > { %s802_s4 = scalar_lea.hbm %s944_s0, %s540_s27  ;;  %s141_s5 = scalar_lea.vmem [#allocation2], %s526_s28 }
  0x14   : > { %s148_s6 = sshll.u32 %s141_s5, 4  ;;  %p806_p13 = pnand %p577_p10, %p778_p5  ;;  %s810_s6 = int_to_ptr.vmem [resolvable:$true] %s148_s6 }
  0x15   : > { %s812_s8 = scalar_lea.sflag [#allocation3], %s137_s26  ;;  %s617_s9 = scalar_lea.hbm %s802_s4, 1024 }
  0x16   : > { %p618_p0 = scmp.ne.s32.totalorder %s802_s4, %s617_s9  ;;  %p619_p1 = pneg %p806_p13 }
  0x17   : > { %s622_s17 = scalar_lea.hbm %s944_s0, 2048  ;;  %p623_p4 = scmp.lt.s32.totalorder %s802_s4, %s944_s0 }
  0x18   : > { %p620_p2 = pnand %p619_p1, %p618_p0  ;;  %p624_p5 = scmp.lt.s32.totalorder %s622_s17, %s617_s9 }
  0x1a   : > { %p621_p3 = pneg %p620_p2  ;;  %p625_p7 = por %p624_p5, %p623_p4 }
  0x1c   : > { %p626_p8 = pnand %p625_p7, %p621_p3 }
  0x1e   : > { %629 = shalt.err (!%p626_p8)
}
  0x1f   : > { %s630_s22 = scalar_lea.vmem %s810_s6, 1024  ;;  %s711_s26 = smov [#allocation2]  }
  0x20   : > { %p631_p10 = scmp.ne.s32.totalorder %s810_s6, %s630_s22  ;;  %s635_s27 = sshll.u32 %s711_s26, 4  ;;  %s636_s27 = int_to_ptr.vmem [resolvable:$false] %s635_s27 }
  0x21   : > { %s637_s28 = scalar_lea.vmem %s636_s27, 2048  ;;  %p638_p2 = scmp.lt.s32.totalorder %s810_s6, %s636_s27 }
  0x22   : > { %p633_p9 = pnand %p631_p10, %p619_p1  ;;  %p639_p12 = scmp.lt.s32.totalorder %s637_s28, %s630_s22 }
  0x24   : > { %p634_p0 = pneg %p633_p9  ;;  %p640_p11 = por %p639_p12, %p638_p2 }
  0x26   : > { %p641_p6 = pnand %p640_p11, %p634_p0 }
  0x28   : > { %644 = shalt.err (!%p641_p6)
}
  0x29   : > { %s712_s29 = smov 256   ;;  %s713_s30 = smov 16  }
  0x2a   : > { %572 = dma.hbm_to_vmem [thread:$0]  (!%p806_p13), %s802_s4, 1024, %s810_s6, %s812_s8, %s712_s29, %s712_s29, %s713_s30  }
  0x2b   : > { %p529_p9 = scmp.ge.s32.totalorder %s709_s15, 1  ;;  %p156_p1 = scmp.lt.s32.totalorder %s709_s15, 3 }
  0x2d   : > { %p157_p3 = pnand %p529_p9, %p156_p1 }
  0x2e   : > { %s836_s5 = sand.u32 (!%p157_p3), 1, %s701_s13   ;;  %p955_p6 = scmp.ne.s32.totalorder (!%p157_p3), %s951_s23, 0 }
  0x2f   : > { %160 = sbr.rel (%p157_p3) target bundleno = 734 (0x2de), region = 32  ;;  %s530_s9 = sshll.u32 (!%p157_p3), %s836_s5, 6 }
  0x30   : > { %s163_s10 = scalar_lea.sflag (!%p157_p3), [#allocation3], %s836_s5  ;;  %s166_s11 = scalar_lea.vmem (!%p157_p3), [#allocation2], %s530_s9 }
  0x34   : > { %688 = dma.done.wait (%p955_p6), %s163_s10, 1024  }
  0x35   : > { %690 = vsyncadd (%p955_p6), %s163_s10, 4294966272  ;;  %v846_v0 = vld [vmem:[%s166_s11] sm:$0xff]  ;;  %v848_v1 = vld [vmem:[%s166_s11 + $0x8] sm:$0xff]  ;;  %v714_v12 = vmov 0.0   ;;  %vm715_vm0 = vmmov 0   ;;  %v221_v17 = vlaneseq  ;;  %vm232_vm1 = vcmask 130112  }
  0x36   : > { %v850_v2 = vld [vmem:[%s166_s11 + $0x20] sm:$0xff]  ;;  %v197_v3 = vadd.f32 %v848_v1, %v846_v0  ;;  %v854_v4 = vld [vmem:[%s166_s11 + $0x28] sm:$0xff]  ;;  %v856_v5 = vld [vmem:[%s166_s11 + $0x10] sm:$0xff]  ;;  %549 = vmatprep.subr.mxu0 %v714_v12  ;;  %560 = vmatprep.subr.mxu1 %v714_v12  ;;  %vm239_vm2 = vcmask 195712   ;;  %vm246_vm3 = vcmask 261312   ;;  %vm248_vm4 = vcmask 261120  }
  0x37   : > { %v858_v6 = vld [vmem:[%s166_s11 + $0x18] sm:$0xff]  ;;  %v203_v7 = vadd.f32 %v854_v4, %v850_v2  ;;  %v862_v8 = vld [vmem:[%s166_s11 + $0x30] sm:$0xff]  ;;  %v214_v15 = vld [vmem:[%s945_s1 + $0x8] sm:$0xff]  ;;  %557 = vmatprep.mubr.msk.f32.mxu0 %vm715_vm0, %v714_v12  ;;  %562 = vmatprep.mubr.msk.f32.mxu1 %vm715_vm0, %v714_v12  ;;  %v222_v18 = vand.u32 127, %v221_v17  ;;  %v224_v19 = vshrl.u32 %v221_v17, 7  ;;  %vm327_vm5 = vcmask 1041408  }
  0x38   : > { %v864_v9 = vld [vmem:[%s166_s11 + $0x38] sm:$0xff]  ;;  %198 = vadd.xlane.f32.xlu0 %v197_v3  ;;  %v200_v10 = vadd.f32 %v858_v6, %v856_v5  ;;  %v215_v14 = vld [vmem:[%s945_s1 + $0x10] sm:$0xff]  ;;  %v213_v16 = vld [vmem:[%s945_s1] sm:$0xff]  ;;  %vm323_vm6 = vcmask 15360   ;;  %s188_s27 = scalar_lea.vmem [#allocation5], %s530_s9  ;;  %s541_s29 = sshll.u32 %s760_s16, 10 }
  0x39   : > { %204 = vadd.xlane.f32.xlu1 %v203_v7  ;;  %v206_v11 = vadd.f32 %v864_v9, %v862_v8  ;;  %v216_v13 = vld [vmem:[%s945_s1 + $0x18] sm:$0xff]  ;;  %v227_v20 = vadd.s32 4294967288, %v222_v18  ;;  %v234_v22 = vadd.s32 4294967280, %v222_v18  ;;  %v241_v23 = vadd.s32 4294967272, %v222_v18  ;;  %v322_v42 = vld [vmem:[%s946_s2] sm:$0x3]  ;;  %s899_s10 = scalar_lea.hbm %s947_s3, %s541_s29 }
  0x3a   : > { %550 = vmatpush3.msra.mxu0 %v216_v13  ;;  %v225_v25 = vsub.s32 %v222_v18, %v224_v19  ;;  %561 = vmatpush3.msk.msra.mxu1 %vm327_vm5, %v322_v42  ;;  %v403_v46 = vsub.s32 0, %v224_v19  ;;  %s450_s28 = sshll.u32 %s188_s27, 4  ;;  %s437_s16 = scalar_lea.sflag [#allocation4], %s836_s5  ;;  %s894_s28 = int_to_ptr.vmem [resolvable:$true] %s450_s28 }
  0x3b   : > { %551 = vmatprep.subr.mxu0 %v714_v12  ;;  %v230_v27 = vsub.s32 %v227_v20, %v224_v19  ;;  %v237_v28 = vsub.s32 %v234_v22, %v224_v19  ;;  %v244_v31 = vsub.s32 %v241_v23, %v224_v19  ;;  %s645_s11 = scalar_lea.vmem %s894_s28, 1024  ;;  %p956_p12 = scmp.ne.s32.totalorder %s952_s24, 0 }
  0x3c   : > { %201 = vadd.xlane.f32.xlu0 %v200_v10  ;;  %552 = vmatpush3.msra.mxu0 %v215_v14  ;;  %p646_p11 = scmp.ne.s32.totalorder %s894_s28, %s645_s11  ;;  %s716_s23 = smov [#allocation5]  }
  0x3d   : > { %207 = vadd.xlane.f32.xlu1 %v206_v11  ;;  %553 = vmatprep.subr.mxu0 %v714_v12  ;;  %s649_s4 = sshll.u32 %s716_s23, 4  ;;  %s650_s4 = int_to_ptr.vmem [resolvable:$false] %s649_s4 }
  0x3e   : > { %554 = vmatpush3.msra.mxu0 %v214_v15  ;;  %p647_p13 = pnand %p646_p11, %p956_p12  ;;  %s651_s6 = scalar_lea.vmem %s650_s4, 2048 }
  0x3f   : > { %555 = vmatprep.subr.mxu0 %v714_v12  ;;  %p652_p5 = scmp.lt.s32.totalorder %s894_s28, %s650_s4  ;;  %p653_p7 = scmp.lt.s32.totalorder %s651_s6, %s645_s11 }
  0x40   : > { %556 = vmatpush3.msra.mxu0 %v213_v16  ;;  %p648_p4 = pneg %p647_p13 }
  0x41   : > { %p654_p8 = por %p653_p7, %p652_p5 }
  0x43   : > { %p655_p10 = pnand %p654_p8, %p648_p4 }
  0xc1   : > { %v199_v21 = vpop.xlane.xlu0 %198 }
  0xc2   : > { %v205_v24 = vpop.xlane.xlu1 %204  ;;  %v209_v26 = vmul.f32 0.00390625, %v199_v21 }
  0xc3   : > { %v211_v29 = vmul.f32 0.00390625, %v205_v24 }
  0xc4   : > { %v226_v35 = vrot.slane %v209_v26, %v225_v25 }
  0xc5   : > { %v202_v30 = vpop.xlane.xlu0 %201  ;;  %v238_v37 = vrot.slane %v211_v29, %v237_v28 }
  0xc6   : > { %v210_v32 = vmul.f32 0.00390625, %v202_v30  ;;  %v208_v33 = vpop.xlane.xlu1 %207 }
  0xc7   : > { %v212_v34 = vmul.f32 0.00390625, %v208_v33 }
  0xc8   : > { %v231_v36 = vrot.slane %v210_v32, %v230_v27 }
  0xc9   : > { %v245_v38 = vrot.slane %v212_v34, %v244_v31 }
  0xca   : > { %v233_v39 = vsel %vm232_vm1, %v231_v36, %v226_v35 }
  0xcb   : > { %v240_v40 = vsel %vm239_vm2, %v238_v37, %v233_v39 }
  0xcc   : > { %v247_v41 = vsel %vm246_vm3, %v245_v38, %v240_v40 }
  0xcd   : > { %558 = vmatmul.mubr.msk.f32.vlgmr.msra.gmra.mxu0 %vm248_vm4, %v247_v41 }
 0x18d   : > { %v317_v43 = vpop.f32.mrf.mxu0 }
 0x18e   : > { %v321_v44 = vmax.f32 %v317_v43, 0.0 }
 0x18f   : > { %v559_v45 = vpop.f32.mrf.mxu0 }
 0x190   : > { %563 = vmatmul.mubr.msk.f32.vlgmr.msra.gmra.mxu1 %vm323_vm6, %v321_v44 }
 0x250   : > { %v397_v47 = vpop.f32.mrf.mxu1 }
 0x251   : > { %v404_v48 = vrot.slane %v397_v47, %v403_v46 }
 0x252   : > { %v564_v49 = vpop.f32.mrf.mxu1 }
 0x253   : > { %410 = vbcast.lane.b32.xlu1 %v404_v48, 264  ;;  %406 = vbcast.lane.b32.xlu0 %v404_v48, 256 }
 0x257   : > { %414 = vbcast.lane.b32.xlu1 %v404_v48, 272 }
 0x25b   : > { %418 = vbcast.lane.b32.xlu1 %v404_v48, 280 }
 0x2c5   : > { %v411_v50 = vpop.permute.xlu1 %410  ;;  %v407_v51 = vpop.permute.xlu0 %406 }
 0x2c6   : > { %v422_v52 = vmul.f32 %v411_v50, %v856_v5  ;;  %v423_v53 = vmul.f32 %v411_v50, %v858_v6  ;;  %v420_v54 = vmul.f32 %v407_v51, %v846_v0  ;;  %v421_v55 = vmul.f32 %v407_v51, %v848_v1 }
 0x2c8   : > { %430 = vst [vmem:[%s188_s27 + $0x10] sm:$0xff] %v422_v52  ;;  %431 = vst [vmem:[%s188_s27 + $0x18] sm:$0xff] %v423_v53 }
 0x2c9   : > { %428 = vst [vmem:[%s188_s27] sm:$0xff] %v420_v54  ;;  %429 = vst [vmem:[%s188_s27 + $0x8] sm:$0xff] %v421_v55  ;;  %v415_v56 = vpop.permute.xlu1 %414 }
 0x2ca   : > { %v424_v57 = vmul.f32 %v415_v56, %v850_v2  ;;  %v425_v58 = vmul.f32 %v415_v56, %v854_v4 }
 0x2cc   : > { %432 = vst [vmem:[%s188_s27 + $0x20] sm:$0xff] %v424_v57  ;;  %433 = vst [vmem:[%s188_s27 + $0x28] sm:$0xff] %v425_v58 }
 0x2cd   : > { %v419_v59 = vpop.permute.xlu1 %418 }
 0x2ce   : > { %v426_v60 = vmul.f32 %v419_v59, %v862_v8  ;;  %v427_v61 = vmul.f32 %v419_v59, %v864_v9 }
 0x2d0   : > { %434 = vst [vmem:[%s188_s27 + $0x30] sm:$0xff] %v426_v60  ;;  %435 = vst [vmem:[%s188_s27 + $0x38] sm:$0xff] %v427_v61 }
 0x2d1   : > { %658 = shalt.err (!%p655_p10)
}
 0x2d2   : > { %s659_s7 = scalar_lea.hbm %s899_s10, 1024  ;;  %s663_s19 = scalar_lea.hbm %s947_s3, 2048 }
 0x2d3   : > { %p660_p0 = scmp.ne.s32.totalorder %s899_s10, %s659_s7  ;;  %p664_p1 = scmp.lt.s32.totalorder %s899_s10, %s947_s3 }
 0x2d4   : > { %p665_p3 = scmp.lt.s32.totalorder %s663_s19, %s659_s7 }
 0x2d5   : > { %p661_p2 = pnand %p660_p0, %p956_p12 }
 0x2d6   : > { %p666_p6 = por %p665_p3, %p664_p1 }
 0x2d7   : > { %p662_p9 = pneg %p661_p2 }
 0x2d9   : > { %p667_p11 = pnand %p666_p6, %p662_p9 }
 0x2db   : > { %670 = shalt.err (!%p667_p11)
}
 0x2dc   : > { %s717_s26 = smov 256   ;;  %s718_s27 = smov 16  }
 0x2dd   : > { %567 = dma.vmem_to_hbm [thread:$0]  (%p956_p12), %s894_s28, 1024, %s899_s10, %s437_s16, %s717_s26, %s717_s26, %s718_s27  }
 0x2de PF: > { %s465_s29 = sand.u32 1, %s697_s12   ;;  %p957_p13 = scmp.ne.s32.totalorder %s953_s25, 0 }
 0x2df   : > { %p958_p4 = scmp.ge.s32.totalorder %s709_s15, 2  ;;  %s466_s30 = scalar_lea.sflag [#allocation4], %s465_s29 }
 0x2e1   : > { %p574_p5 = pnand %p958_p4, %p957_p13 }
 0x2e3   : > { %p575_p7 = pneg %p574_p5 }
 0x2e5   : > { %692 = dma.done.wait (%p575_p7), %s466_s30, 1024  }
 0x2e6   : > { %694 = vsyncadd (%p575_p7), %s466_s30, 4294966272  ;;  %p16_p8 = scmp.ge.s32.totalorder %s764_s18, 4   ;;  %s959_s12 = smov %s701_s13 }
 0x2e7   : > { %s960_s13 = smov %s705_s14  ;;  %s961_s14 = smov %s776_s21 }
 0x2e8   : > { %s962_s15 = smov %s764_s18  ;;  %18 = sbr.rel (!%p16_p8) target bundleno = 5 (0x5), region = 77 }
 0x2ed   :  { %471 = vsyncpa [#allocation3], 1 }
 0x2ee   :  { %473 = vsyncpa [#allocation3 + $0x1], 1 }
 0x2ef   :  { %474 = vsyncpa [#allocation4], 1 }
 0x2f0   :  { %476 = vsyncpa [#allocation4 + $0x1], 1 }

</bundles_post_ra>
